<compile_context>
chip_gen: v7x
topology: tpu7x:2x2x1
jax: 0.10.0
libtpu: 0.0.40
codegen_flags: <defaults>
</compile_context>

<pallas_src>
import functools

import jax
import jax.numpy as jnp
from jax.experimental import pallas as pl
from jax.experimental.pallas import tpu as pltpu


def _encoder_kernel(x_ref, w1_ref, b1_ref, wh_ref, bh_ref, mean_ref, logvar_ref):
    # linear1: [TB, x_dim] @ [x_dim, hidden]  (f32 accumulation on the MXU)
    h = jnp.dot(x_ref[...], w1_ref[...], preferred_element_type=jnp.float32)
    h = h + b1_ref[...]                       # bias + activation stay in f32 (v5e VPU)
    h = jnp.where(h >= 0, h, 0.01 * h)        # LeakyReLU, PyTorch default slope

    # fused heads: [TB, hidden] @ [hidden, 2*z_dim]
    hm = h.astype(wh_ref.dtype)               # no-op in f32; bf16 cast otherwise
    out = jnp.dot(hm, wh_ref[...], preferred_element_type=jnp.float32) + bh_ref[...]

    # Split mean / log_var inside the kernel -> no wrapper-side slice copies.
    z = mean_ref.shape[-1]
    mean_ref[...] = out[:, :z].astype(mean_ref.dtype)
    logvar_ref[...] = out[:, z:].astype(logvar_ref.dtype)


def _round_up(n, m):
    return ((n + m - 1) // m) * m


def _select_tile_and_vmem(B, block_b, x_dim, hidden, out_dim, z_dim,
                          x_itemsize, w_itemsize, out_itemsize):
    """Pick the batch tile and an explicit VMEM limit.

    Budget: resident weights + double-buffered x / mean / log_var tiles +
    f32 intermediates, against a conservative 40 MiB figure that is safe on
    v7x (64 MiB physical per TC) as well as v5e/v6e (128 MiB physical, but
    16/32 MiB default scoped limits -> we also pass vmem_limit_bytes).
    """
    resident = ((x_dim * hidden + hidden * out_dim) * w_itemsize
                + (hidden + out_dim) * 4)                       # biases stay f32
    per_row = (2 * x_dim * x_itemsize                           # double-buffered x tile
               + 2 * 2 * z_dim * out_itemsize                   # 2x (mean, log_var) tiles
               + (hidden + out_dim) * 4)                        # f32 intermediates
    budget = 40 * 1024 * 1024

    tb = min(block_b, B)
    if tb >= B:
        tb = B
        # v7x megacore: once the batch is big enough, split into >= 2 grid
        # steps so both TensorCores get work on the "parallel" axis.
        if B >= 512:
            tb = _round_up(pl.cdiv(B, 2), 8)
    else:
        tb = max(8, (tb // 8) * 8)            # sublane-aligned partial tiles

    # Shrink until the double-buffered working set fits the budget.
    while tb > 8 and resident + tb * per_row > budget:
        tb = max(8, (tb // 2 // 8) * 8)

    needed = resident + tb * per_row
    vmem_limit = int(min(max(2 * needed, 16 * 1024 * 1024), 64 * 1024 * 1024))
    return tb, vmem_limit


def pack_head_params(wmu, bmu, wls, bls):
    """Pre-pack the mu / log_sigma heads ONCE (not per forward call)."""
    w_heads = jnp.concatenate([wmu, wls], axis=1)      # (hidden, 2*z_dim)
    b_heads = jnp.concatenate([bmu, bls], axis=1)      # (1, 2*z_dim)
    return w_heads, b_heads


@functools.partial(jax.jit, static_argnames=("block_b", "out_dtype"))
def encoder_forward(x, w1, b1, w_heads, b_heads, *, block_b=1024,
                    out_dtype=jnp.float32):
    """x: [B, x_dim] (f32 or bf16 — supplied by the producer, never cast here);
    w1: (x_dim, hidden); b1: (1, hidden);
    w_heads: (hidden, 2*z_dim); b_heads: (1, 2*z_dim)  (see pack_head_params).

    Returns (mean, log_var), each [B, z_dim] in `out_dtype`.
    """
    B, x_dim = x.shape
    hidden = w1.shape[1]
    out_dim = w_heads.shape[1]
    z_dim = out_dim // 2

    # Match the (tiny) weights to x's dtype so the MXU sees uniform inputs.
    # Accumulation stays f32 via preferred_element_type; biases stay f32.
    mxu_dtype = x.dtype if x.dtype in (jnp.bfloat16, jnp.float32) else jnp.float32
    w1 = w1.astype(mxu_dtype)
    w_heads = w_heads.astype(mxu_dtype)
    b1 = b1.astype(jnp.float32)
    b_heads = b_heads.astype(jnp.float32)

    tb, vmem_limit = _select_tile_and_vmem(
        B, block_b, x_dim, hidden, out_dim, z_dim,
        x_itemsize=jnp.dtype(x.dtype).itemsize,
        w_itemsize=jnp.dtype(mxu_dtype).itemsize,
        out_itemsize=jnp.dtype(out_dtype).itemsize,
    )
    grid = (pl.cdiv(B, tb),)

    mean, log_var = pl.pallas_call(
        _encoder_kernel,
        out_shape=(
            jax.ShapeDtypeStruct((B, z_dim), out_dtype),
            jax.ShapeDtypeStruct((B, z_dim), out_dtype),
        ),
        grid=grid,
        in_specs=[
            pl.BlockSpec((tb, x_dim), lambda i: (i, 0)),        # x: tiled over batch
            pl.BlockSpec((x_dim, hidden), lambda i: (0, 0)),    # weights: VMEM-resident
            pl.BlockSpec((1, hidden), lambda i: (0, 0)),
            pl.BlockSpec((hidden, out_dim), lambda i: (0, 0)),
            pl.BlockSpec((1, out_dim), lambda i: (0, 0)),
        ],
        out_specs=(
            pl.BlockSpec((tb, z_dim), lambda i: (i, 0)),        # mean
            pl.BlockSpec((tb, z_dim), lambda i: (i, 0)),        # log_var
        ),
        compiler_params=pltpu.CompilerParams(
            dimension_semantics=("parallel",),                  # v7x megacore batch split
            vmem_limit_bytes=vmem_limit,                        # v5e 16MiB / v7x 64MiB safe
        ),
    )(x, w1, b1, w_heads, b_heads)

    # TODO(synk): if production dims stay this narrow (<128 lanes), pad hidden /
    # 2*z_dim to 128 (or emit a [2z, B]-transposed slab) for unmasked 128-lane
    # stores; irrelevant while the f32 read of x dominates HBM traffic.
    return mean, log_var


def _init_linear(key, in_features, out_features):
    """Deterministic init mimicking nn.Linear default (uniform +/- 1/sqrt(in))."""
    kw, kb = jax.random.split(key)
    bound = 1.0 / (in_features ** 0.5)
    # stored as (in, out) so the kernel does x @ W directly
    w = jax.random.uniform(kw, (in_features, out_features), jnp.float32,
                           minval=-bound, maxval=bound)
    b = jax.random.uniform(kb, (1, out_features), jnp.float32,
                           minval=-bound, maxval=bound)
    return w, b


def _reference(x, w1, b1, wmu, bmu, wls, bls):
    h = x @ w1 + b1
    h = jnp.where(h >= 0, h, 0.01 * h)
    return h @ wmu + bmu, h @ wls + bls


if __name__ == "__main__":
    # Small shapes consistent with the module's forward: x is [batch, x_dim].
    B, x_dim, hidden_dim, z_dim = 64, 32, 64, 16

    key = jax.random.PRNGKey(0)
    kx, k1, k2, k3 = jax.random.split(key, 4)

    x = jax.random.normal(kx, (B, x_dim), jnp.float32)
    w1, b1 = _init_linear(k1, x_dim, hidden_dim)
    wmu, bmu = _init_linear(k2, hidden_dim, z_dim)
    wls, bls = _init_linear(k3, hidden_dim, z_dim)

    # Pack the head weights ONCE (outside the jitted forward).
    w_heads, b_heads = pack_head_params(wmu, bmu, wls, bls)

    mean_ref, logvar_ref = _reference(x, w1, b1, wmu, bmu, wls, bls)

    # --- f32 path, default tile (single grid step at this tiny size) ---
    mean, log_var = encoder_forward(x, w1, b1, w_heads, b_heads)
    jax.block_until_ready((mean, log_var))
    assert jnp.allclose(mean, mean_ref, atol=1e-5, rtol=1e-5)
    assert jnp.allclose(log_var, logvar_ref, atol=1e-5, rtol=1e-5)

    # --- multi-step grid + producer-supplied bf16 x (relaxed tolerance) ---
    x_bf16 = x.astype(jnp.bfloat16)            # producer-side cast, not in the wrapper
    mean_bf, logvar_bf = encoder_forward(x_bf16, w1, b1, w_heads, b_heads,
                                         block_b=32)
    jax.block_until_ready((mean_bf, logvar_bf))
    assert jnp.allclose(mean_bf, mean_ref, atol=5e-2, rtol=5e-2)
    assert jnp.allclose(logvar_bf, logvar_ref, atol=5e-2, rtol=5e-2)

    print("KERNEL_OK")
</pallas_src>

<mosaic_0001>
module attributes {stable_mosaic.version = 11 : i64} {
  func.func @_encoder_kernel(%arg0: i32, %arg1: memref<64x32xf32, #tpu.memory_space<vmem>>, %arg2: memref<32x64xf32, #tpu.memory_space<vmem>>, %arg3: memref<1x64xf32, #tpu.memory_space<vmem>>, %arg4: memref<64x32xf32, #tpu.memory_space<vmem>>, %arg5: memref<1x32xf32, #tpu.memory_space<vmem>>, %arg6: memref<64x16xf32, #tpu.memory_space<vmem>>, %arg7: memref<64x16xf32, #tpu.memory_space<vmem>>) attributes {dimension_semantics = [#tpu.dimension_semantics<parallel>], iteration_bounds = array<i64: 1>, scalar_prefetch = 0 : i64, scratch_operands = 0 : i64, tpu.core_type = #tpu.core_type<tc>, window_params = [{transform_indices = @transform_0, window_bounds = array<i64: 64, 32>}, {pipeline_mode = #tpu.pipeline_mode<synchronous>, transform_indices = @transform_1, window_bounds = array<i64: 32, 64>}, {pipeline_mode = #tpu.pipeline_mode<synchronous>, transform_indices = @transform_2, window_bounds = array<i64: 1, 64>}, {pipeline_mode = #tpu.pipeline_mode<synchronous>, transform_indices = @transform_3, window_bounds = array<i64: 64, 32>}, {pipeline_mode = #tpu.pipeline_mode<synchronous>, transform_indices = @transform_4, window_bounds = array<i64: 1, 32>}, {transform_indices = @transform_5, window_bounds = array<i64: 64, 16>}, {transform_indices = @transform_6, window_bounds = array<i64: 64, 16>}]} {
    %c0 = arith.constant 0 : index
    %c0_0 = arith.constant 0 : index
    %0 = vector.load %arg1[%c0, %c0_0] : memref<64x32xf32, #tpu.memory_space<vmem>>, vector<64x32xf32>
    %c0_1 = arith.constant 0 : index
    %c0_2 = arith.constant 0 : index
    %1 = vector.load %arg2[%c0_1, %c0_2] : memref<32x64xf32, #tpu.memory_space<vmem>>, vector<32x64xf32>
    %cst = arith.constant dense<0.000000e+00> : vector<64x64xf32>
    %2 = tpu.matmul %0, %1, %cst {dimension_numbers = #tpu.dot_dimension_numbers<[1], [0], [0], [1], [0, 0, 1, 1], [], []>} : vector<64x32xf32>, vector<32x64xf32>, vector<64x64xf32> -> vector<64x64xf32>
    %c0_3 = arith.constant 0 : index
    %c0_4 = arith.constant 0 : index
    %3 = vector.load %arg3[%c0_3, %c0_4] : memref<1x64xf32, #tpu.memory_space<vmem>>, vector<1x64xf32>
    %4 = vector.broadcast %3 : vector<1x64xf32> to vector<64x64xf32>
    %5 = arith.addf %2, %4 : vector<64x64xf32>
    %cst_5 = arith.constant 0.000000e+00 : f32
    %6 = vector.broadcast %cst_5 : f32 to vector<64x64xf32>
    %7 = arith.cmpf oge, %5, %6 : vector<64x64xf32>
    %cst_6 = arith.constant 0.00999999977 : f32
    %8 = vector.broadcast %cst_6 : f32 to vector<64x64xf32>
    %9 = arith.mulf %8, %5 : vector<64x64xf32>
    %10 = arith.select %7, %5, %9 : vector<64x64xi1>, vector<64x64xf32>
    %c0_7 = arith.constant 0 : index
    %c0_8 = arith.constant 0 : index
    %11 = vector.load %arg4[%c0_7, %c0_8] : memref<64x32xf32, #tpu.memory_space<vmem>>, vector<64x32xf32>
    %cst_9 = arith.constant dense<0.000000e+00> : vector<64x32xf32>
    %12 = tpu.matmul %10, %11, %cst_9 {dimension_numbers = #tpu.dot_dimension_numbers<[1], [0], [0], [1], [0, 0, 1, 1], [], []>} : vector<64x64xf32>, vector<64x32xf32>, vector<64x32xf32> -> vector<64x32xf32>
    %c0_10 = arith.constant 0 : index
    %c0_11 = arith.constant 0 : index
    %13 = vector.load %arg5[%c0_10, %c0_11] : memref<1x32xf32, #tpu.memory_space<vmem>>, vector<1x32xf32>
    %14 = vector.broadcast %13 : vector<1x32xf32> to vector<64x32xf32>
    %15 = arith.addf %12, %14 : vector<64x32xf32>
    %16 = vector.extract_strided_slice %15 {offsets = [0, 0], sizes = [64, 16], strides = [1, 1]} : vector<64x32xf32> to vector<64x16xf32>
    %c0_12 = arith.constant 0 : index
    %c0_13 = arith.constant 0 : index
    %17 = vector.load %arg6[%c0_12, %c0_13] : memref<64x16xf32, #tpu.memory_space<vmem>>, vector<64x16xf32>
    tpu.vector_store %arg6[%c0_12, %c0_13], %16 {strides = array<i32>} : memref<64x16xf32, #tpu.memory_space<vmem>>, vector<64x16xf32>,
    %18 = vector.extract_strided_slice %15 {offsets = [0, 16], sizes = [64, 16], strides = [1, 1]} : vector<64x32xf32> to vector<64x16xf32>
    %c0_14 = arith.constant 0 : index
    %c0_15 = arith.constant 0 : index
    %19 = vector.load %arg7[%c0_14, %c0_15] : memref<64x16xf32, #tpu.memory_space<vmem>>, vector<64x16xf32>
    tpu.vector_store %arg7[%c0_14, %c0_15], %18 {strides = array<i32>} : memref<64x16xf32, #tpu.memory_space<vmem>>, vector<64x16xf32>,
    return
  }
  func.func @transform_0(%arg0: i32) -> (i32, i32) {
    %c0_i32 = arith.constant 0 : i32
    %c0_i32_0 = arith.constant 0 : i32
    return %arg0, %c0_i32 : i32, i32
  }
  func.func @transform_1(%arg0: i32) -> (i32, i32) {
    %c0_i32 = arith.constant 0 : i32
    %c0_i32_0 = arith.constant 0 : i32
    %c0_i32_1 = arith.constant 0 : i32
    return %c0_i32, %c0_i32_0 : i32, i32
  }
  func.func @transform_2(%arg0: i32) -> (i32, i32) {
    %c0_i32 = arith.constant 0 : i32
    %c0_i32_0 = arith.constant 0 : i32
    %c0_i32_1 = arith.constant 0 : i32
    return %c0_i32, %c0_i32_0 : i32, i32
  }
  func.func @transform_3(%arg0: i32) -> (i32, i32) {
    %c0_i32 = arith.constant 0 : i32
    %c0_i32_0 = arith.constant 0 : i32
    %c0_i32_1 = arith.constant 0 : i32
    return %c0_i32, %c0_i32_0 : i32, i32
  }
  func.func @transform_4(%arg0: i32) -> (i32, i32) {
    %c0_i32 = arith.constant 0 : i32
    %c0_i32_0 = arith.constant 0 : i32
    %c0_i32_1 = arith.constant 0 : i32
    return %c0_i32, %c0_i32_0 : i32, i32
  }
  func.func @transform_5(%arg0: i32) -> (i32, i32) {
    %c0_i32 = arith.constant 0 : i32
    %c0_i32_0 = arith.constant 0 : i32
    return %arg0, %c0_i32 : i32, i32
  }
  func.func @transform_6(%arg0: i32) -> (i32, i32) {
    %c0_i32 = arith.constant 0 : i32
    %c0_i32_0 = arith.constant 0 : i32
    return %arg0, %c0_i32 : i32, i32
  }
}

</mosaic_0001>

<bundles_post_ra>
// kernel: encoder_forward.1
= control target key start
LH: loop header
LB: loop body
LE: loop exit
PB: predicated region body
PF: predicated region fallthrough
CT: control target
= control target key end

     0   :  { %vm41_vm0 = vcmask 261120   ;;  %vm210_vm3 = vcmask 523264   ;;  %vm340_vm10 = vcmask 130048   ;;  %s524_s14 = smov 112   ;;  %s706_s1 = inlined_call_operand.vmem [shape: f32[32,64], index: 1, kind: input, shape index: {}]   ;;  %s707_s0 = inlined_call_operand.vmem [shape: f32[64,32], index: 0, kind: input, shape index: {}]   ;;  %s708_s3 = inlined_call_operand.vmem [shape: f32[64,32], index: 3, kind: input, shape index: {}]   ;;  %s709_s2 = inlined_call_operand.vmem [shape: f32[1,64], index: 2, kind: input, shape index: {}]   ;;  %s710_s4 = inlined_call_operand.vmem [shape: f32[1,32], index: 4, kind: input, shape index: {}]   ;;  %s711_s5 = inlined_call_operand.vmem [shape: f32[64,16], index: 5, kind: output, shape index: {0}]   ;;  %s712_s6 = inlined_call_operand.vmem [shape: f32[64,16], index: 6, kind: output, shape index: {1}]  }
   0x1   :  { %v30_v0 = vld [vmem:[%s706_s1] sm:$0xff]  ;;  %v31_v1 = vld [vmem:[%s706_s1 + $0x8] sm:$0xff]  ;;  %v32_v2 = vld [vmem:[%s706_s1 + $0x10] sm:$0xff] }
   0x2   :  { %v491_v3 = vpack.c.bf16 %v31_v1, %v30_v0  ;;  %v33_v4 = vld [vmem:[%s706_s1 + $0x18] sm:$0xff]  ;;  %v22_v5 = vld [vmem:[%s707_s0] sm:$0xff]  ;;  %v196_v8 = vld [vmem:[%s708_s3 + $0x8] sm:$0xff] }
   0x3   :  { %v495_v6 = vpack.c.bf16 %v33_v4, %v32_v2  ;;  %451 = vmatprep.mubr.msk.f32.mxu0 %vm41_vm0, %v22_v5  ;;  %v195_v7 = vld [vmem:[%s708_s3] sm:$0xff]  ;;  %v197_v9 = vld [vmem:[%s708_s3 + $0x10] sm:$0xff]  ;;  %v198_v11 = vld [vmem:[%s708_s3 + $0x18] sm:$0xff] }
   0x4   :  { %492 = vmatprep.subr.bf16.mxu0 %v491_v3  ;;  %v499_v10 = vpack.c.bf16 %v196_v8, %v195_v7  ;;  %v503_v12 = vpack.c.bf16 %v198_v11, %v197_v9  ;;  %v23_v13 = vld [vmem:[%s707_s0 + $0x8] sm:$0xff]  ;;  %v24_v14 = vld [vmem:[%s707_s0 + $0x10] sm:$0xff]  ;;  %v25_v15 = vld [vmem:[%s707_s0 + $0x18] sm:$0xff] }
   0x5   :  { %494 = vmatpush3.bf16.msra.mxu0 %v491_v3  ;;  %v26_v16 = vld [vmem:[%s707_s0 + $0x20] sm:$0xff]  ;;  %v27_v17 = vld [vmem:[%s707_s0 + $0x28] sm:$0xff]  ;;  %v28_v18 = vld [vmem:[%s707_s0 + $0x30] sm:$0xff] }
   0x6   :  { %496 = vmatprep.subr.bf16.mxu0 %v495_v6  ;;  %515 = vmatprep.subr.bf16.mxu1 %v499_v10  ;;  %v29_v19 = vld [vmem:[%s707_s0 + $0x38] sm:$0xff]  ;;  %v199_v20 = vld [vmem:[%s708_s3 + $0x20] sm:$0xff]  ;;  %v200_v21 = vld [vmem:[%s708_s3 + $0x28] sm:$0xff] }
   0x7   :  { %519 = vmatpush3.bf16.msra.mxu1 %v499_v10  ;;  %v507_v22 = vpack.c.bf16 %v200_v21, %v199_v20  ;;  %v201_v23 = vld [vmem:[%s708_s3 + $0x30] sm:$0xff]  ;;  %v202_v24 = vld [vmem:[%s708_s3 + $0x38] sm:$0xff]  ;;  %v397_v26 = vld [vmem:[%s709_s2] ss:$0 sm:$0xff] }
   0x8   :  { %516 = vmatprep.subr.bf16.mxu1 %v503_v12  ;;  %v511_v25 = vpack.c.bf16 %v202_v24, %v201_v23  ;;  %v406_v59 = vld [vmem:[%s710_s4] ss:$0 sm:$0xff] }
   0x9   :  { %498 = vmatpush3.bf16.msra.mxu0 %v495_v6 }
   0xa   :  { %500 = vmatprep.subr.bf16.mxu0 %v499_v10 }
   0xb   :  { %520 = vmatpush3.bf16.msra.mxu1 %v503_v12 }
   0xc   :  { %452 = vmatmul.mubr.msk.f32.vlgmr.msra.gmra.mrb[0].mxu0 %vm41_vm0, %v23_v13  ;;  %517 = vmatprep.subr.bf16.mxu1 %v507_v22 }
   0xd   :  { %454 = vmatprep.mubr.msk.f32.mxu0 %vm41_vm0, %v24_v14  ;;  %502 = vmatpush3.bf16.msra.mxu0 %v499_v10 }
   0xe   :  { %504 = vmatprep.subr.bf16.mxu0 %v503_v12 }
   0xf   :  { %521 = vmatpush3.bf16.msra.mxu1 %v507_v22 }
  0x10   :  { %455 = vmatmul.mubr.msk.f32.gmra.mrb[2].mxu0 %vm41_vm0, %v25_v15  ;;  %518 = vmatprep.subr.bf16.mxu1 %v511_v25 }
  0x11   :  { %457 = vmatprep.mubr.msk.f32.mxu0 %vm41_vm0, %v26_v16  ;;  %506 = vmatpush3.bf16.msra.mxu0 %v503_v12 }
  0x12   :  { %508 = vmatprep.subr.bf16.mxu0 %v507_v22 }
  0x13   :  { %522 = vmatpush3.bf16.msra.mxu1 %v511_v25 }
  0x14   :  { %458 = vmatmul.mubr.msk.f32.gmra.mrb[4].mxu0 %vm41_vm0, %v27_v17 }
  0x15   :  { %460 = vmatprep.mubr.msk.f32.mxu0 %vm41_vm0, %v28_v18  ;;  %510 = vmatpush3.bf16.msra.mxu0 %v507_v22 }
  0x16   :  { %512 = vmatprep.subr.bf16.mxu0 %v511_v25 }
  0x18   :  { %461 = vmatmul.mubr.msk.f32.gmra.mrb[6].mxu0 %vm41_vm0, %v29_v19 }
  0x19   :  { %514 = vmatpush3.bf16.msra.mxu0 %v511_v25 }
  0xdf   :  { %v453_v27 = vpop.f32.mrb[0].mxu0 }
  0xe0   :  { %v138_v28 = vadd.f32 %v453_v27, %v397_v26  ;;  %v132_v29 = vpop.f32.mrb[1].mxu0 }
  0xe1   :  { %v133_v30 = vadd.f32 %v397_v26, %v132_v29 }
  0xe2   :  { %v180_v31 = vmul.f32 0.01, %v138_v28  ;;  %vm172_vm1 = vcmp.ge.f32.partialorder %v138_v28, 0.0 }
  0xe3   :  { %vm171_vm2 = vcmp.ge.f32.partialorder %v133_v30, 0.0  ;;  %v179_v32 = vmul.f32 0.01, %v133_v30  ;;  %v456_v33 = vpop.f32.mrb[2].mxu0 }
  0xe4   :  { %v148_v34 = vadd.f32 %v456_v33, %v397_v26  ;;  %v142_v35 = vpop.f32.mrb[3].mxu0  ;;  %v188_v38 = vsel %vm172_vm1, %v138_v28, %v180_v31 }
  0xe5   :  { %v143_v36 = vadd.f32 %v397_v26, %v142_v35  ;;  %v187_v37 = vsel %vm171_vm2, %v133_v30, %v179_v32 }
  0xe6   :  { %v182_v39 = vmul.f32 0.01, %v148_v34  ;;  %479 = vmatprep.mubr.msk.f32.mxu0 %vm210_vm3, %v187_v37  ;;  %vm174_vm4 = vcmp.ge.f32.partialorder %v148_v34, 0.0 }
  0xe7   :  { %v459_v40 = vpop.f32.mrb[4].mxu0  ;;  %480 = vmatmul.mubr.msk.f32.vlgmr.msra.gmra.mrb[8].mxu0 %vm210_vm3, %v188_v38  ;;  %vm173_vm5 = vcmp.ge.f32.partialorder %v143_v36, 0.0  ;;  %v181_v41 = vmul.f32 0.01, %v143_v36 }
  0xe8   :  { %v158_v42 = vadd.f32 %v459_v40, %v397_v26  ;;  %v152_v43 = vpop.f32.mrb[5].mxu0  ;;  %v190_v47 = vsel %vm174_vm4, %v148_v34, %v182_v39 }
  0xe9   :  { %v153_v44 = vadd.f32 %v397_v26, %v152_v43  ;;  %v189_v45 = vsel %vm173_vm5, %v143_v36, %v181_v41 }
  0xea   :  { %vm176_vm6 = vcmp.ge.f32.partialorder %v158_v42, 0.0  ;;  %v184_v46 = vmul.f32 0.01, %v158_v42  ;;  %482 = vmatprep.mubr.msk.f32.mxu1 %vm210_vm3, %v189_v45 }
  0xeb   :  { %vm175_vm7 = vcmp.ge.f32.partialorder %v153_v44, 0.0  ;;  %v183_v48 = vmul.f32 0.01, %v153_v44  ;;  %v462_v49 = vpop.f32.mrb[6].mxu0  ;;  %483 = vmatmul.mubr.msk.f32.vlgmr.msra.gmra.mrb[0].mxu1 %vm210_vm3, %v190_v47 }
  0xec   :  { %v168_v50 = vadd.f32 %v462_v49, %v397_v26  ;;  %v162_v51 = vpop.f32.mrb[7].mxu0  ;;  %v192_v52 = vsel %vm176_vm6, %v158_v42, %v184_v46 }
  0xed   :  { %v163_v53 = vadd.f32 %v397_v26, %v162_v51  ;;  %v191_v54 = vsel %vm175_vm7, %v153_v44, %v183_v48 }
  0xee   :  { %vm178_vm8 = vcmp.ge.f32.partialorder %v168_v50, 0.0  ;;  %v186_v55 = vmul.f32 0.01, %v168_v50  ;;  %485 = vmatprep.mubr.msk.f32.mxu1 %vm210_vm3, %v191_v54 }
  0xef   :  { %vm177_vm9 = vcmp.ge.f32.partialorder %v163_v53, 0.0  ;;  %v185_v56 = vmul.f32 0.01, %v163_v53  ;;  %486 = vmatmul.mubr.msk.f32.gmra.mrb[2].mxu1 %vm210_vm3, %v192_v52 }
  0xf0   :  { %v194_v57 = vsel %vm178_vm8, %v168_v50, %v186_v55 }
  0xf1   :  { %v193_v58 = vsel %vm177_vm9, %v163_v53, %v185_v56 }
  0xf2   :  { %488 = vmatprep.mubr.msk.f32.mxu1 %vm210_vm3, %v193_v58 }
  0xf3   :  { %489 = vmatmul.mubr.msk.f32.gmra.mrb[4].mxu1 %vm210_vm3, %v194_v57 }
 0x1ba   :  { %v481_v60 = vpop.f32.mrb[8].mxu0 }
 0x1bb   :  { %v307_v61 = vadd.f32 %v481_v60, %v406_v59  ;;  %v301_v62 = vpop.f32.mrb[9].mxu0 }
 0x1bc   :  { %v302_v63 = vadd.f32 %v406_v59, %v301_v62 }
 0x1bd   :  { %342 = vst.msk [vmem:[%s711_s5 + $0x8] sm:$0xff] %vm340_vm10, %v307_v61  ;;  %359 = vrot.lane.b32.xlu0 %v307_v61, %s524_s14 }
 0x1be   :  { %341 = vst.msk [vmem:[%s711_s5] sm:$0xff] %vm340_vm10, %v302_v63  ;;  %v484_v0 = vpop.f32.mrb[0].mxu1 }
 0x1bf   :  { %v317_v1 = vadd.f32 %v484_v0, %v406_v59  ;;  %v311_v2 = vpop.f32.mrb[1].mxu1 }
 0x1c0   :  { %v312_v3 = vadd.f32 %v406_v59, %v311_v2 }
 0x1c1   :  { %344 = vst.msk [vmem:[%s711_s5 + $0x18] sm:$0xff] %vm340_vm10, %v317_v1  ;;  %363 = vrot.lane.b32.xlu1 %v317_v1, %s524_s14  ;;  %357 = vrot.lane.b32.xlu0 %v302_v63, %s524_s14 }
 0x1c2   :  { %343 = vst.msk [vmem:[%s711_s5 + $0x10] sm:$0xff] %vm340_vm10, %v312_v3  ;;  %v487_v4 = vpop.f32.mrb[2].mxu1 }
 0x1c3   :  { %v327_v5 = vadd.f32 %v487_v4, %v406_v59  ;;  %v321_v6 = vpop.f32.mrb[3].mxu1 }
 0x1c4   :  { %v322_v7 = vadd.f32 %v406_v59, %v321_v6 }
 0x1c5   :  { %346 = vst.msk [vmem:[%s711_s5 + $0x28] sm:$0xff] %vm340_vm10, %v327_v5  ;;  %361 = vrot.lane.b32.xlu1 %v312_v3, %s524_s14 }
 0x1c6   :  { %345 = vst.msk [vmem:[%s711_s5 + $0x20] sm:$0xff] %vm340_vm10, %v322_v7  ;;  %v490_v8 = vpop.f32.mrb[4].mxu1  ;;  %365 = vrot.lane.b32.xlu0 %v322_v7, %s524_s14 }
 0x1c7   :  { %v337_v9 = vadd.f32 %v490_v8, %v406_v59  ;;  %v331_v10 = vpop.f32.mrb[5].mxu1 }
 0x1c8   :  { %v332_v11 = vadd.f32 %v406_v59, %v331_v10 }
 0x1c9   :  { %348 = vst.msk [vmem:[%s711_s5 + $0x38] sm:$0xff] %vm340_vm10, %v337_v9  ;;  %367 = vrot.lane.b32.xlu1 %v327_v5, %s524_s14 }
 0x1ca   :  { %347 = vst.msk [vmem:[%s711_s5 + $0x30] sm:$0xff] %vm340_vm10, %v332_v11  ;;  %369 = vrot.lane.b32.xlu0 %v332_v11, %s524_s14 }
 0x1cd   :  { %371 = vrot.lane.b32.xlu1 %v337_v9, %s524_s14 }
 0x22f   :  { %v360_v12 = vpop.permute.xlu0 %359 }
 0x230   :  { %382 = vst.msk [vmem:[%s712_s6 + $0x8] sm:$0xff] %vm340_vm10, %v360_v12 }
 0x233   :  { %v364_v13 = vpop.permute.xlu1 %363  ;;  %v358_v14 = vpop.permute.xlu0 %357 }
 0x234   :  { %384 = vst.msk [vmem:[%s712_s6 + $0x18] sm:$0xff] %vm340_vm10, %v364_v13  ;;  %381 = vst.msk [vmem:[%s712_s6] sm:$0xff] %vm340_vm10, %v358_v14 }
 0x237   :  { %v362_v15 = vpop.permute.xlu1 %361 }
 0x238   :  { %383 = vst.msk [vmem:[%s712_s6 + $0x10] sm:$0xff] %vm340_vm10, %v362_v15  ;;  %v366_v16 = vpop.permute.xlu0 %365 }
 0x239   :  { %385 = vst.msk [vmem:[%s712_s6 + $0x20] sm:$0xff] %vm340_vm10, %v366_v16 }
 0x23b   :  { %v368_v17 = vpop.permute.xlu1 %367 }
 0x23c   :  { %386 = vst.msk [vmem:[%s712_s6 + $0x28] sm:$0xff] %vm340_vm10, %v368_v17  ;;  %v370_v18 = vpop.permute.xlu0 %369 }
 0x23d   :  { %387 = vst.msk [vmem:[%s712_s6 + $0x30] sm:$0xff] %vm340_vm10, %v370_v18 }
 0x23f   :  { %v372_v19 = vpop.permute.xlu1 %371 }
 0x240   :  { %388 = vst.msk [vmem:[%s712_s6 + $0x38] sm:$0xff] %vm340_vm10, %v372_v19 }

</bundles_post_ra>
